<compile_context>
chip_gen: v6e
topology: v6e:2x2x1
jax: 0.10.0
libtpu: 0.0.40
codegen_flags: <defaults>
</compile_context>

<pallas_src>
import functools
import math

import jax
import jax.numpy as jnp
from jax.experimental import pallas as pl
from jax.experimental.pallas import tpu as pltpu

DEPTHS = (3, 3, 27, 3)          # convnext_small
DIMS = (96, 192, 384, 768)
EPS = 1e-6
LAYER_SCALE_INIT = 1e-6
_VMEM_LIMIT = 48 * 1024 * 1024  # <= 48 MiB: leaves headroom on v7x (64 MiB/TC)


# ----------------------------------------------------------------------------
# in-kernel math helpers
# ----------------------------------------------------------------------------
def _erf(x):
    # Abramowitz & Stegun 7.1.26, |err| <= 1.5e-7; the reciprocal goes to the
    # EUP (approx vrcp) so it co-issues with VALU/MXU work.
    ax = jnp.abs(x)
    t = pl.reciprocal(1.0 + 0.3275911 * ax, approx=True)
    poly = t * (0.254829592 + t * (-0.284496736 + t * (1.421413741
            + t * (-1.453152027 + t * 1.061405429))))
    y = 1.0 - poly * jnp.exp(-ax * ax)
    return jnp.where(x >= 0.0, y, -y)


def _gelu_exact(x):
    # torch.nn.GELU() default (erf-based, not tanh approximation)
    return 0.5 * x * (1.0 + _erf(x * (1.0 / math.sqrt(2.0))))


def _layernorm(x, g, b):
    mu = jnp.mean(x, axis=-1, keepdims=True)
    d = x - mu
    var = jnp.mean(d * d, axis=-1, keepdims=True)
    return d * jax.lax.rsqrt(var + EPS) * g + b


# ----------------------------------------------------------------------------
# Pallas kernels
# ----------------------------------------------------------------------------
def _block_kernel(x_ref, dww_ref, dwb_ref, g_ref, bt_ref, w1_ref, b1_ref,
                  w2_ref, b2_ref, sc_ref, o_ref, pad_ref, dw_ref):
    # One fused CNBlock for one batch element.
    #   x_ref/o_ref : (1, H*W, C) activations (rows = pixels, C on lanes)
    #   pad_ref     : (H+6, W+6, C) VMEM scratch (zero halo, no HBM pad copy)
    #   dw_ref      : (H*W, C)     VMEM scratch (dwconv result as rows)
    Hp6, Wp6, C = pad_ref.shape
    H, W = Hp6 - 6, Wp6 - 6

    # --- build the zero-padded tile in VMEM ---------------------------------
    pad_ref[...] = jnp.zeros_like(pad_ref)
    for h in range(H):
        pad_ref[3 + h, 3:3 + W, :] = x_ref[0, h * W:(h + 1) * W, :]

    # --- depthwise 7x7 conv: 49 shifted taps on the VPU ---------------------
    w = dww_ref[...]                                   # (49, C)
    acc = jnp.zeros((H, W, C), jnp.float32)
    for dy in range(7):
        for dx in range(7):
            acc = acc + pad_ref[dy:dy + H, dx:dx + W, :] * w[dy * 7 + dx, :]
    # relayout (H, W, C) -> (H*W, C) rows through the VMEM scratch
    for h in range(H):
        dw_ref[h * W:(h + 1) * W, :] = acc[h]

    # --- LayerNorm -> Linear(C,4C) -> GELU -> Linear(4C,C) -> scale -> +res -
    y = dw_ref[...] + dwb_ref[...]
    y = _layernorm(y, g_ref[...], bt_ref[...])
    hid = jnp.dot(y.astype(jnp.bfloat16), w1_ref[...],
                  preferred_element_type=jnp.float32) + b1_ref[...]
    hid = _gelu_exact(hid)
    out = jnp.dot(hid.astype(jnp.bfloat16), w2_ref[...],
                  preferred_element_type=jnp.float32) + b2_ref[...]
    # stochastic depth is identity in eval mode (feature_extractor.eval())
    o_ref[0] = x_ref[0] + sc_ref[...] * out


def _ln_kernel(x_ref, g_ref, b_ref, o_ref):
    o_ref[...] = _layernorm(x_ref[...], g_ref[...], b_ref[...])


def _linear_kernel(x_ref, w_ref, b_ref, o_ref):
    o_ref[...] = (jnp.dot(x_ref[...].astype(jnp.bfloat16), w_ref[...],
                          preferred_element_type=jnp.float32) + b_ref[...])


def _linear_ln_kernel(x_ref, w_ref, b_ref, g_ref, bt_ref, o_ref):
    y = (jnp.dot(x_ref[...].astype(jnp.bfloat16), w_ref[...],
                 preferred_element_type=jnp.float32) + b_ref[...])
    o_ref[...] = _layernorm(y, g_ref[...], bt_ref[...])


# ----------------------------------------------------------------------------
# cached pallas_call builders (one compile per distinct shape config)
# ----------------------------------------------------------------------------
def _row_tile(M, target=512):
    # largest divisor of M that is <= target (avoids partial blocks)
    t = min(M, target)
    while M % t:
        t -= 1
    return t


@functools.lru_cache(maxsize=None)
def _build_block(B, H, W, C):
    C4 = 4 * C
    HW = H * W
    return jax.jit(pl.pallas_call(
        _block_kernel,
        out_shape=jax.ShapeDtypeStruct((B, HW, C), jnp.float32),
        grid=(B,),
        in_specs=[
            pl.BlockSpec((1, HW, C), lambda b: (b, 0, 0)),   # x
            pl.BlockSpec((49, C), lambda b: (0, 0)),         # dw taps
            pl.BlockSpec((1, C), lambda b: (0, 0)),          # dw bias
            pl.BlockSpec((1, C), lambda b: (0, 0)),          # ln gamma
            pl.BlockSpec((1, C), lambda b: (0, 0)),          # ln beta
            pl.BlockSpec((C, C4), lambda b: (0, 0)),         # w1 (bf16)
            pl.BlockSpec((1, C4), lambda b: (0, 0)),         # b1
            pl.BlockSpec((C4, C), lambda b: (0, 0)),         # w2 (bf16)
            pl.BlockSpec((1, C), lambda b: (0, 0)),          # b2
            pl.BlockSpec((1, C), lambda b: (0, 0)),          # layer scale
        ],
        out_specs=pl.BlockSpec((1, HW, C), lambda b: (b, 0, 0)),
        scratch_shapes=[pltpu.VMEM((H + 6, W + 6, C), jnp.float32),
                        pltpu.VMEM((HW, C), jnp.float32)],
        compiler_params=pltpu.CompilerParams(
            dimension_semantics=("parallel",),
            vmem_limit_bytes=_VMEM_LIMIT),
    ))


@functools.lru_cache(maxsize=None)
def _build_ln(M, C):
    TM = _row_tile(M)
    return jax.jit(pl.pallas_call(
        _ln_kernel,
        out_shape=jax.ShapeDtypeStruct((M, C), jnp.float32),
        grid=(M // TM,),
        in_specs=[pl.BlockSpec((TM, C), lambda i: (i, 0)),
                  pl.BlockSpec((1, C), lambda i: (0, 0)),
                  pl.BlockSpec((1, C), lambda i: (0, 0))],
        out_specs=pl.BlockSpec((TM, C), lambda i: (i, 0)),
        compiler_params=pltpu.CompilerParams(
            dimension_semantics=("parallel",),
            vmem_limit_bytes=_VMEM_LIMIT),
    ))


@functools.lru_cache(maxsize=None)
def _build_linear(M, K, N, with_ln):
    TM = _row_tile(M)
    kernel = _linear_ln_kernel if with_ln else _linear_kernel
    in_specs = [pl.BlockSpec((TM, K), lambda i: (i, 0)),     # row-tiled acts
                pl.BlockSpec((K, N), lambda i: (0, 0)),      # resident weight
                pl.BlockSpec((1, N), lambda i: (0, 0))]      # bias
    if with_ln:
        in_specs += [pl.BlockSpec((1, N), lambda i: (0, 0)),
                     pl.BlockSpec((1, N), lambda i: (0, 0))]
    return jax.jit(pl.pallas_call(
        kernel,
        out_shape=jax.ShapeDtypeStruct((M, N), jnp.float32),
        grid=(M // TM,),
        in_specs=in_specs,
        out_specs=pl.BlockSpec((TM, N), lambda i: (i, 0)),
        compiler_params=pltpu.CompilerParams(
            dimension_semantics=("parallel",),
            vmem_limit_bytes=_VMEM_LIMIT),
    ))


# ----------------------------------------------------------------------------
# wrappers (glue)
# ----------------------------------------------------------------------------
def cnblock(x, p):
    B, H, W, C = x.shape
    out = _build_block(B, H, W, C)(
        x.reshape(B, H * W, C),
        p["dw_w"], p["dw_b"].reshape(1, C),
        p["ln_g"].reshape(1, C), p["ln_b"].reshape(1, C),
        p["w1"], p["b1"].reshape(1, -1),
        p["w2"], p["b2"].reshape(1, C),
        p["scale"].reshape(1, C))
    return out.reshape(B, H, W, C)


def layernorm_rows(x, g, b):
    N, C = x.shape
    return _build_ln(N, C)(x, g.reshape(1, C), b.reshape(1, C))


def linear(x, w, b):
    M, K = x.shape
    N = w.shape[1]
    return _build_linear(M, K, N, False)(x, w, b.reshape(1, N))


def linear_ln(x, w, b, g, bt):
    M, K = x.shape
    N = w.shape[1]
    return _build_linear(M, K, N, True)(
        x, w, b.reshape(1, N), g.reshape(1, N), bt.reshape(1, N))


def extract_patches(x, s):
    # stride==kernel conv -> non-overlapping patch flatten (order (dy, dx, c))
    # TODO(synk): real torchvision weights are (out, in, kh, kw) and would need
    # reordering to this (kh, kw, in) flatten order.
    B, H, W, C = x.shape
    Hp, Wp = H // s, W // s
    x = x.reshape(B, Hp, s, Wp, s, C).transpose(0, 1, 3, 2, 4, 5)
    return x.reshape(B * Hp * Wp, s * s * C), (B, Hp, Wp)


# ----------------------------------------------------------------------------
# parameters (deterministic synthetic init, shapes of convnext_small + head)
# matmul weights are stored bf16 (MXU-native, half the weight HBM traffic)
# ----------------------------------------------------------------------------
def make_params(key):
    keys = iter(jax.random.split(key, 256))

    def nrm(shape, std=0.02, dtype=jnp.bfloat16):
        return (std * jax.random.normal(next(keys), shape, jnp.float32)
                ).astype(dtype)

    def zeros(shape):
        return jnp.zeros(shape, jnp.float32)

    def ones(shape):
        return jnp.ones(shape, jnp.float32)

    params = {
        "stem": dict(w=nrm((3 * 4 * 4, DIMS[0])), b=zeros((DIMS[0],)),
                     ln_g=ones((DIMS[0],)), ln_b=zeros((DIMS[0],))),
        "stages": [], "down": [],
        "cls": dict(w=nrm((DIMS[-1], 3)), b=zeros((3,))),
    }
    for s, (depth, dim) in enumerate(zip(DEPTHS, DIMS)):
        blocks = []
        for _ in range(depth):
            blocks.append(dict(
                dw_w=nrm((49, dim), std=0.1, dtype=jnp.float32),
                dw_b=zeros((dim,)),
                ln_g=ones((dim,)), ln_b=zeros((dim,)),
                w1=nrm((dim, 4 * dim)), b1=zeros((4 * dim,)),
                w2=nrm((4 * dim, dim)), b2=zeros((dim,)),
                scale=jnp.full((dim,), LAYER_SCALE_INIT, jnp.float32)))
        params["stages"].append(blocks)
        if s < 3:
            params["down"].append(dict(
                ln_g=ones((dim,)), ln_b=zeros((dim,)),
                w=nrm((4 * dim, DIMS[s + 1])), b=zeros((DIMS[s + 1],))))
    return params


# ----------------------------------------------------------------------------
# forward pass (matches torchvision ConvNeXt-Small features + avgpool + Linear)
# ----------------------------------------------------------------------------
def convnext_forward(x_nchw, params):
    x = jnp.transpose(x_nchw, (0, 2, 3, 1)).astype(jnp.float32)  # -> NHWC

    # stem: Conv 4x4/4 (as patch matmul) + LayerNorm (eps 1e-6), fused kernel
    patches, (B, Hp, Wp) = extract_patches(x, 4)
    y = linear_ln(patches, params["stem"]["w"], params["stem"]["b"],
                  params["stem"]["ln_g"], params["stem"]["ln_b"])
    x = y.reshape(B, Hp, Wp, DIMS[0])

    for s, (depth, dim) in enumerate(zip(DEPTHS, DIMS)):
        for j in range(depth):
            x = cnblock(x, params["stages"][s][j])   # fully fused CNBlock
        if s < 3:
            dp = params["down"][s]
            Bc, Hc, Wc, Cc = x.shape
            xn = layernorm_rows(x.reshape(Bc * Hc * Wc, Cc),
                                dp["ln_g"], dp["ln_b"]).reshape(Bc, Hc, Wc, Cc)
            patches, (Bc, Hp2, Wp2) = extract_patches(xn, 2)
            x = linear(patches, dp["w"], dp["b"]).reshape(
                Bc, Hp2, Wp2, DIMS[s + 1])

    # AdaptiveAvgPool2d(1) + flatten(1)  (trivial spatial reduction, JAX glue)
    feat = jnp.mean(x, axis=(1, 2))                      # (B, 768)
    # classifier: Linear(768, 3)
    return linear(feat, params["cls"]["w"], params["cls"]["b"])


if __name__ == "__main__":
    key = jax.random.PRNGKey(0)
    pkey, xkey = jax.random.split(key)
    params = make_params(pkey)
    # PyTorch-style NCHW input; 32x32 is the smallest size divisible by the
    # total stride of 32 (4 * 2 * 2 * 2).
    x = jax.random.normal(xkey, (2, 3, 32, 32), jnp.float32)
    out = convnext_forward(x, params)
    out = jax.block_until_ready(out)
    assert out.shape == (2, 3) and out.dtype == jnp.float32
    assert bool(jnp.all(jnp.isfinite(out)))
    print("KERNEL_OK")
</pallas_src>

<mosaic_0001>
module attributes {stable_mosaic.version = 11 : i64} {
  func.func @_linear_ln_kernel(%arg0: i32, %arg1: memref<128x48xf32, #tpu.memory_space<vmem>>, %arg2: memref<48x96xbf16, #tpu.memory_space<vmem>>, %arg3: memref<1x96xf32, #tpu.memory_space<vmem>>, %arg4: memref<1x96xf32, #tpu.memory_space<vmem>>, %arg5: memref<1x96xf32, #tpu.memory_space<vmem>>, %arg6: memref<128x96xf32, #tpu.memory_space<vmem>>) attributes {dimension_semantics = [#tpu.dimension_semantics<parallel>], iteration_bounds = array<i64: 1>, scalar_prefetch = 0 : i64, scratch_operands = 0 : i64, tpu.core_type = #tpu.core_type<tc>, window_params = [{transform_indices = @transform_0, window_bounds = array<i64: 128, 48>}, {pipeline_mode = #tpu.pipeline_mode<synchronous>, transform_indices = @transform_1, window_bounds = array<i64: 48, 96>}, {pipeline_mode = #tpu.pipeline_mode<synchronous>, transform_indices = @transform_2, window_bounds = array<i64: 1, 96>}, {pipeline_mode = #tpu.pipeline_mode<synchronous>, transform_indices = @transform_3, window_bounds = array<i64: 1, 96>}, {pipeline_mode = #tpu.pipeline_mode<synchronous>, transform_indices = @transform_4, window_bounds = array<i64: 1, 96>}, {transform_indices = @transform_5, window_bounds = array<i64: 128, 96>}]} {
    %c0 = arith.constant 0 : index
    %c0_0 = arith.constant 0 : index
    %0 = vector.load %arg1[%c0, %c0_0] : memref<128x48xf32, #tpu.memory_space<vmem>>, vector<128x48xf32>
    %1 = arith.truncf %0 : vector<128x48xf32> to vector<128x48xbf16>
    %c0_1 = arith.constant 0 : index
    %c0_2 = arith.constant 0 : index
    %2 = vector.load %arg2[%c0_1, %c0_2] : memref<48x96xbf16, #tpu.memory_space<vmem>>, vector<48x96xbf16>
    %cst = arith.constant dense<0.000000e+00> : vector<128x96xf32>
    %3 = tpu.matmul %1, %2, %cst {dimension_numbers = #tpu.dot_dimension_numbers<[1], [0], [0], [1], [0, 0, 1, 1], [], []>} : vector<128x48xbf16>, vector<48x96xbf16>, vector<128x96xf32> -> vector<128x96xf32>
    %c0_3 = arith.constant 0 : index
    %c0_4 = arith.constant 0 : index
    %4 = vector.load %arg3[%c0_3, %c0_4] : memref<1x96xf32, #tpu.memory_space<vmem>>, vector<1x96xf32>
    %5 = vector.broadcast %4 : vector<1x96xf32> to vector<128x96xf32>
    %6 = arith.addf %3, %5 : vector<128x96xf32>
    %c0_5 = arith.constant 0 : index
    %c0_6 = arith.constant 0 : index
    %7 = vector.load %arg4[%c0_5, %c0_6] : memref<1x96xf32, #tpu.memory_space<vmem>>, vector<1x96xf32>
    %c0_7 = arith.constant 0 : index
    %c0_8 = arith.constant 0 : index
    %8 = vector.load %arg5[%c0_7, %c0_8] : memref<1x96xf32, #tpu.memory_space<vmem>>, vector<1x96xf32>
    %cst_9 = arith.constant dense<0.000000e+00> : vector<128xf32>
    %9 = vector.multi_reduction <add>, %6, %cst_9 [1] : vector<128x96xf32> to vector<128xf32>
    %10 = vector.shape_cast %9 : vector<128xf32> to vector<128x1xf32>
    %cst_10 = arith.constant 9.600000e+01 : f32
    %11 = vector.broadcast %cst_10 : f32 to vector<128x1xf32>
    %12 = arith.divf %10, %11 : vector<128x1xf32>
    %13 = vector.broadcast %12 : vector<128x1xf32> to vector<128x96xf32>
    %14 = arith.subf %6, %13 : vector<128x96xf32>
    %15 = arith.mulf %14, %14 : vector<128x96xf32>
    %cst_11 = arith.constant dense<0.000000e+00> : vector<128xf32>
    %16 = vector.multi_reduction <add>, %15, %cst_11 [1] : vector<128x96xf32> to vector<128xf32>
    %17 = vector.shape_cast %16 : vector<128xf32> to vector<128x1xf32>
    %cst_12 = arith.constant 9.600000e+01 : f32
    %18 = vector.broadcast %cst_12 : f32 to vector<128x1xf32>
    %19 = arith.divf %17, %18 : vector<128x1xf32>
    %cst_13 = arith.constant 9.99999997E-7 : f32
    %20 = vector.broadcast %cst_13 : f32 to vector<128x1xf32>
    %21 = arith.addf %19, %20 : vector<128x1xf32>
    %22 = math.rsqrt %21 : vector<128x1xf32>
    %23 = vector.broadcast %22 : vector<128x1xf32> to vector<128x96xf32>
    %24 = arith.mulf %14, %23 : vector<128x96xf32>
    %25 = vector.broadcast %7 : vector<1x96xf32> to vector<128x96xf32>
    %26 = arith.mulf %24, %25 : vector<128x96xf32>
    %27 = vector.broadcast %8 : vector<1x96xf32> to vector<128x96xf32>
    %28 = arith.addf %26, %27 : vector<128x96xf32>
    %c0_14 = arith.constant 0 : index
    %c0_15 = arith.constant 0 : index
    %29 = vector.load %arg6[%c0_14, %c0_15] : memref<128x96xf32, #tpu.memory_space<vmem>>, vector<128x96xf32>
    tpu.vector_store %arg6[%c0_14, %c0_15], %28 {strides = array<i32>} : memref<128x96xf32, #tpu.memory_space<vmem>>, vector<128x96xf32>,
    return
  }
  func.func @transform_0(%arg0: i32) -> (i32, i32) {
    %c0_i32 = arith.constant 0 : i32
    %c0_i32_0 = arith.constant 0 : i32
    return %arg0, %c0_i32 : i32, i32
  }
  func.func @transform_1(%arg0: i32) -> (i32, i32) {
    %c0_i32 = arith.constant 0 : i32
    %c0_i32_0 = arith.constant 0 : i32
    %c0_i32_1 = arith.constant 0 : i32
    return %c0_i32, %c0_i32_0 : i32, i32
  }
  func.func @transform_2(%arg0: i32) -> (i32, i32) {
    %c0_i32 = arith.constant 0 : i32
    %c0_i32_0 = arith.constant 0 : i32
    %c0_i32_1 = arith.constant 0 : i32
    return %c0_i32, %c0_i32_0 : i32, i32
  }
  func.func @transform_3(%arg0: i32) -> (i32, i32) {
    %c0_i32 = arith.constant 0 : i32
    %c0_i32_0 = arith.constant 0 : i32
    %c0_i32_1 = arith.constant 0 : i32
    return %c0_i32, %c0_i32_0 : i32, i32
  }
  func.func @transform_4(%arg0: i32) -> (i32, i32) {
    %c0_i32 = arith.constant 0 : i32
    %c0_i32_0 = arith.constant 0 : i32
    %c0_i32_1 = arith.constant 0 : i32
    return %c0_i32, %c0_i32_0 : i32, i32
  }
  func.func @transform_5(%arg0: i32) -> (i32, i32) {
    %c0_i32 = arith.constant 0 : i32
    %c0_i32_0 = arith.constant 0 : i32
    return %arg0, %c0_i32 : i32, i32
  }
}

</mosaic_0001>

<bundles_post_ra>
// kernel: tpu_custom_call.1
= control target key start
LH: loop header
LB: loop body
LE: loop exit
PB: predicated region body
PF: predicated region fallthrough
CT: control target
= control target key end

     0   :  { %vm76_vm0 = vcmask 392192   ;;  %vm200_vm1 = vcmask 785408   ;;  %s938_s1 = inlined_call_operand.vmem [shape: bf16[48,96], index: 1, kind: input, shape index: {}]   ;;  %s939_s0 = inlined_call_operand.vmem [shape: f32[128,48], index: 0, kind: input, shape index: {}]   ;;  %s940_s2 = inlined_call_operand.vmem [shape: f32[1,96], index: 2, kind: input, shape index: {}]   ;;  %s941_s3 = inlined_call_operand.vmem [shape: f32[1,96], index: 3, kind: input, shape index: {}]   ;;  %s942_s4 = inlined_call_operand.vmem [shape: f32[1,96], index: 4, kind: input, shape index: {}]   ;;  %s943_s5 = inlined_call_operand.vmem [shape: f32[128,96], index: 5, kind: output, shape index: {}]  }
   0x1   :  { %v527_v0 = vld [vmem:[%s938_s1 + $0x10] sm:$0xff]   ;;  %v528_v1 = vld [vmem:[%s938_s1 + $0x8] sm:$0xff]   ;;  %v21_v2 = vld [vmem:[%s939_s0] sm:$0xff] }
   0x2   :  { %499 = vmatprep.subr.bf16.mxu0 %v527_v0  ;;  %521 = vmatprep.subr.bf16.mxu1 %v527_v0  ;;  %v22_v3 = vld [vmem:[%s939_s0 + $0x8] sm:$0xff]  ;;  %v29_v4 = vld [vmem:[%s939_s0 + $0x40] sm:$0xff]  ;;  %v23_v9 = vld [vmem:[%s939_s0 + $0x10] sm:$0xff] }
   0x3   :  { %500 = vmatpush3.bf16.msra.mxu0 %v527_v0  ;;  %524 = vmatpush3.bf16.msra.mxu1 %v527_v0  ;;  %v529_v5 = vld [vmem:[%s938_s1] sm:$0xff]   ;;  %v37_v6 = vpack.c.bf16 %v22_v3, %v21_v2  ;;  %v30_v7 = vld [vmem:[%s939_s0 + $0x48] sm:$0xff]  ;;  %v24_v10 = vld [vmem:[%s939_s0 + $0x18] sm:$0xff] }
   0x4   :  { %501 = vmatprep.subr.bf16.mxu0 %v528_v1  ;;  %522 = vmatprep.subr.bf16.mxu1 %v528_v1  ;;  %v41_v8 = vpack.c.bf16 %v30_v7, %v29_v4  ;;  %v31_v11 = vld [vmem:[%s939_s0 + $0x50] sm:$0xff]  ;;  %v32_v12 = vld [vmem:[%s939_s0 + $0x58] sm:$0xff]  ;;  %v25_v13 = vld [vmem:[%s939_s0 + $0x20] sm:$0xff]  ;;  %v38_v17 = vpack.c.bf16 %v24_v10, %v23_v9 }
   0x5   :  { %505 = vmatprep.mubr.msk.bf16.mxu0 %vm76_vm0, %v37_v6  ;;  %v26_v14 = vld [vmem:[%s939_s0 + $0x28] sm:$0xff]  ;;  %v33_v15 = vld [vmem:[%s939_s0 + $0x60] sm:$0xff]  ;;  %v42_v18 = vpack.c.bf16 %v32_v12, %v31_v11  ;;  %v27_v21 = vld [vmem:[%s939_s0 + $0x30] sm:$0xff] }
   0x6   :  { %v34_v16 = vld [vmem:[%s939_s0 + $0x68] sm:$0xff]  ;;  %513 = vmatprep.mubr.msk.bf16.mxu1 %vm76_vm0, %v41_v8  ;;  %v39_v19 = vpack.c.bf16 %v26_v14, %v25_v13  ;;  %v28_v22 = vld [vmem:[%s939_s0 + $0x38] sm:$0xff]  ;;  %v35_v23 = vld [vmem:[%s939_s0 + $0x70] sm:$0xff] }
   0x7   :  { %502 = vmatpush3.bf16.msra.mxu0 %v528_v1  ;;  %525 = vmatpush3.bf16.msra.mxu1 %v528_v1  ;;  %v43_v20 = vpack.c.bf16 %v34_v16, %v33_v15  ;;  %v36_v24 = vld [vmem:[%s939_s0 + $0x78] sm:$0xff]  ;;  %v40_v25 = vpack.c.bf16 %v28_v22, %v27_v21  ;;  %v474_v27 = vld [vmem:[%s940_s2] ss:$0 sm:$0xff] }
   0x8   :  { %503 = vmatprep.subr.bf16.mxu0 %v529_v5  ;;  %523 = vmatprep.subr.bf16.mxu1 %v529_v5  ;;  %v44_v26 = vpack.c.bf16 %v36_v24, %v35_v23 }
   0xb   :  { %504 = vmatpush3.bf16.msra.mxu0 %v529_v5  ;;  %526 = vmatpush3.bf16.msra.mxu1 %v529_v5 }
   0xe   :  { %506 = vmatmul.mubr.msk.bf16.vlgmr.msra.gmra.mxu0 %vm76_vm0, %v38_v17  ;;  %514 = vmatmul.mubr.msk.bf16.vlgmr.msra.gmra.mxu1 %vm76_vm0, %v42_v18 }
   0xf   :  { %509 = vmatprep.mubr.msk.bf16.mxu0 %vm76_vm0, %v39_v19  ;;  %517 = vmatprep.mubr.msk.bf16.mxu1 %vm76_vm0, %v43_v20 }
  0x16   :  { %510 = vmatmul.mubr.msk.bf16.gmra.mxu0 %vm76_vm0, %v40_v25  ;;  %518 = vmatmul.mubr.msk.bf16.gmra.mxu1 %vm76_vm0, %v44_v26 }
  0xce   :  { %v507_v28 = vpop.f32.mrf.mxu0  ;;  %v515_v29 = vpop.f32.mrf.mxu1 }
  0xcf   :  { %v660_v30 = vadd.f32 %v507_v28, %v474_v27  ;;  %v662_v31 = vadd.f32 %v515_v29, %v474_v27 }
  0xd0   :  { %v135_v32 = vpop.f32.mrf.mxu0  ;;  %v167_v33 = vpop.f32.mrf.mxu1 }
  0xd1   :  { %v664_v34 = vadd.f32 %v474_v27, %v135_v32  ;;  %v231_v35 = vsel %vm200_vm1, %v662_v31, 0.0  ;;  %v207_v36 = vsel %vm200_vm1, %v660_v30, 0.0  ;;  %v670_v42 = vadd.f32 %v474_v27, %v167_v33 }
  0xd2   :  { %232 = vadd.xlane.f32.xlu0 %v231_v35  ;;  %v516_v37 = vpop.f32.mrf.mxu1  ;;  %208 = vadd.xlane.f32.xlu1 %v207_v36  ;;  %v508_v38 = vpop.f32.mrf.mxu0 }
  0xd3   :  { %v147_v39 = vadd.f32 %v508_v38, %v474_v27  ;;  %v672_v43 = vadd.f32 %v516_v37, %v474_v27  ;;  %v201_v45 = vsel %vm200_vm1, %v664_v34, 0.0  ;;  %v225_v52 = vsel %vm200_vm1, %v670_v42, 0.0 }
  0xd4   :  { %v138_v40 = vpop.f32.mrf.mxu0  ;;  %v170_v41 = vpop.f32.mrf.mxu1 }
  0xd5   :  { %v210_v44 = vsel %vm200_vm1, %v147_v39, 0.0  ;;  %v677_v49 = vadd.f32 %v474_v27, %v138_v40  ;;  %v679_v50 = vadd.f32 %v474_v27, %v170_v41  ;;  %v234_v51 = vsel %vm200_vm1, %v672_v43, 0.0 }
  0xd6   :  { %211 = vadd.xlane.f32.xlu1 %v210_v44  ;;  %202 = vadd.xlane.f32.xlu0 %v201_v45  ;;  %v511_v46 = vpop.f32.mrf.mxu0  ;;  %v519_v47 = vpop.f32.mrf.mxu1 }
  0xd7   :  { %v685_v55 = vadd.f32 %v511_v46, %v474_v27  ;;  %v228_v57 = vsel %vm200_vm1, %v679_v50, 0.0  ;;  %v204_v58 = vsel %vm200_vm1, %v677_v49, 0.0  ;;  %v709_v6 = vadd.f32 %v519_v47, %v474_v27 }
  0xd8   :  { %v151_v48 = vpop.f32.mrf.mxu0  ;;  %v183_v54 = vpop.f32.mrf.mxu1 }
  0xd9   :  { %v219_v62 = vsel %vm200_vm1, %v685_v55, 0.0  ;;  %v697_v63 = vadd.f32 %v474_v27, %v151_v48  ;;  %v701_v2 = vadd.f32 %v474_v27, %v183_v54  ;;  %v243_v11 = vsel %vm200_vm1, %v709_v6, 0.0 }
  0xda   :  { %235 = vadd.xlane.f32.xlu1 %v234_v51  ;;  %226 = vadd.xlane.f32.xlu0 %v225_v52  ;;  %v512_v53 = vpop.f32.mrf.mxu0  ;;  %v520_v60 = vpop.f32.mrf.mxu1 }
  0xdb   :  { %v687_v56 = vadd.f32 %v512_v53, %v474_v27  ;;  %v213_v5 = vsel %vm200_vm1, %v697_v63, 0.0  ;;  %v711_v7 = vadd.f32 %v520_v60, %v474_v27  ;;  %v237_v9 = vsel %vm200_vm1, %v701_v2, 0.0 }
  0xdc   :  { %v154_v59 = vpop.f32.mrf.mxu0  ;;  %v186_v1 = vpop.f32.mrf.mxu1 }
  0xdd   :  { %v222_v61 = vsel %vm200_vm1, %v687_v56, 0.0  ;;  %v699_v0 = vadd.f32 %v474_v27, %v154_v59  ;;  %v703_v3 = vadd.f32 %v474_v27, %v186_v1  ;;  %v246_v10 = vsel %vm200_vm1, %v711_v7, 0.0 }
  0xde   :  { %229 = vadd.xlane.f32.xlu1 %v228_v57  ;;  %205 = vadd.xlane.f32.xlu0 %v204_v58 }
  0xdf   :  { %v216_v4 = vsel %vm200_vm1, %v699_v0, 0.0  ;;  %v240_v8 = vsel %vm200_vm1, %v703_v3, 0.0 }
  0xe2   :  { %223 = vadd.xlane.f32.xlu1 %v222_v61  ;;  %220 = vadd.xlane.f32.xlu0 %v219_v62 }
  0xe6   :  { %217 = vadd.xlane.f32.xlu1 %v216_v4  ;;  %214 = vadd.xlane.f32.xlu0 %v213_v5 }
  0xea   :  { %241 = vadd.xlane.f32.xlu1 %v240_v8  ;;  %238 = vadd.xlane.f32.xlu0 %v237_v9 }
  0xee   :  { %247 = vadd.xlane.f32.xlu1 %v246_v10  ;;  %244 = vadd.xlane.f32.xlu0 %v243_v11 }
 0x15b   :  { %v233_v12 = vpop.xlane.xlu0 %232  ;;  %v209_v13 = vpop.xlane.xlu1 %208 }
 0x15c   :  { %v260_v14 = vmul.f32 0.010416667, %v233_v12  ;;  %v252_v15 = vmul.f32 0.010416667, %v209_v13 }
 0x15e   :  { %v722_v16 = vsub.f32 %v662_v31, %v260_v14  ;;  %v725_v17 = vsub.f32 %v660_v30, %v252_v15 }
 0x15f   :  { %v212_v18 = vpop.xlane.xlu1 %211  ;;  %v203_v19 = vpop.xlane.xlu0 %202 }
 0x160   :  { %v253_v20 = vmul.f32 0.010416667, %v212_v18  ;;  %v250_v21 = vmul.f32 0.010416667, %v203_v19  ;;  %v284_v22 = vmul.f32 %v725_v17, %v725_v17  ;;  %v292_v26 = vmul.f32 %v722_v16, %v722_v16 }
 0x162   :  { %v729_v23 = vsub.f32 %v147_v39, %v253_v20  ;;  %v732_v24 = vsub.f32 %v664_v34, %v250_v21  ;;  %v304_v25 = vsel %vm200_vm1, %v284_v22, 0.0  ;;  %v328_v36 = vsel %vm200_vm1, %v292_v26, 0.0 }
 0x163   :  { %v236_v27 = vpop.xlane.xlu1 %235  ;;  %305 = vadd.xlane.f32.xlu0 %v304_v25  ;;  %v227_v28 = vpop.xlane.xlu0 %226 }
 0x164   :  { %v261_v29 = vmul.f32 0.010416667, %v236_v27  ;;  %v258_v30 = vmul.f32 0.010416667, %v227_v28  ;;  %v285_v31 = vmul.f32 %v729_v23, %v729_v23  ;;  %v282_v32 = vmul.f32 %v732_v24, %v732_v24 }
 0x166   :  { %v742_v33 = vsub.f32 %v672_v43, %v261_v29  ;;  %v745_v34 = vsub.f32 %v670_v42, %v258_v30  ;;  %v307_v35 = vsel %vm200_vm1, %v285_v31, 0.0  ;;  %v298_v44 = vsel %vm200_vm1, %v282_v32, 0.0 }
 0x167   :  { %v230_v37 = vpop.xlane.xlu1 %229  ;;  %308 = vadd.xlane.f32.xlu1 %v307_v35  ;;  %329 = vadd.xlane.f32.xlu0 %v328_v36  ;;  %v206_v38 = vpop.xlane.xlu0 %205 }
 0x168   :  { %v259_v39 = vmul.f32 0.010416667, %v230_v37  ;;  %v251_v40 = vmul.f32 0.010416667, %v206_v38  ;;  %v293_v41 = vmul.f32 %v742_v33, %v742_v33  ;;  %v290_v46 = vmul.f32 %v745_v34, %v745_v34 }
 0x16a   :  { %v753_v43 = vsub.f32 %v679_v50, %v259_v39  ;;  %v756_v42 = vsub.f32 %v677_v49, %v251_v40  ;;  %v331_v45 = vsel %vm200_vm1, %v293_v41, 0.0  ;;  %v322_v57 = vsel %vm200_vm1, %v290_v46, 0.0 }
 0x16b   :  { %v224_v47 = vpop.xlane.xlu1 %223  ;;  %332 = vadd.xlane.f32.xlu1 %v331_v45  ;;  %299 = vadd.xlane.f32.xlu0 %v298_v44  ;;  %v221_v48 = vpop.xlane.xlu0 %220 }
 0x16c   :  { %v257_v51 = vmul.f32 0.010416667, %v224_v47  ;;  %v256_v52 = vmul.f32 0.010416667, %v221_v48  ;;  %v283_v53 = vmul.f32 %v756_v42, %v756_v42  ;;  %v291_v50 = vmul.f32 %v753_v43, %v753_v43 }
 0x16e   :  { %v766_v49 = vsub.f32 %v687_v56, %v257_v51  ;;  %v769_v54 = vsub.f32 %v685_v55, %v256_v52  ;;  %v301_v58 = vsel %vm200_vm1, %v283_v53, 0.0  ;;  %v325_v4 = vsel %vm200_vm1, %v291_v50, 0.0 }
 0x16f   :  { %v218_v59 = vpop.xlane.xlu1 %217  ;;  %323 = vadd.xlane.f32.xlu0 %v322_v57  ;;  %302 = vadd.xlane.f32.xlu1 %v301_v58  ;;  %v215_v60 = vpop.xlane.xlu0 %214 }
 0x170   :  { %v255_v61 = vmul.f32 0.010416667, %v218_v59  ;;  %v254_v62 = vmul.f32 0.010416667, %v215_v60  ;;  %v288_v1 = vmul.f32 %v769_v54, %v769_v54  ;;  %v289_v8 = vmul.f32 %v766_v49, %v766_v49 }
 0x172   :  { %v777_v56 = vsub.f32 %v699_v0, %v255_v61  ;;  %v780_v55 = vsub.f32 %v697_v63, %v254_v62  ;;  %v316_v5 = vsel %vm200_vm1, %v288_v1, 0.0  ;;  %v319_v15 = vsel %vm200_vm1, %v289_v8, 0.0  ;;  %v819_v8 = vld [vmem:[%s941_s3] ss:$0 sm:$0xff] }
 0x173   :  { %v242_v9 = vpop.xlane.xlu1 %241  ;;  %326 = vadd.xlane.f32.xlu1 %v325_v4  ;;  %317 = vadd.xlane.f32.xlu0 %v316_v5  ;;  %v239_v10 = vpop.xlane.xlu0 %238 }
 0x174   :  { %v263_v11 = vmul.f32 0.010416667, %v242_v9  ;;  %v262_v12 = vmul.f32 0.010416667, %v239_v10  ;;  %v286_v13 = vmul.f32 %v780_v55, %v780_v55  ;;  %v287_v0 = vmul.f32 %v777_v56, %v777_v56 }
 0x176   :  { %v790_v63 = vsub.f32 %v703_v3, %v263_v11  ;;  %v793_v14 = vsub.f32 %v701_v2, %v262_v12  ;;  %v310_v18 = vsel %vm200_vm1, %v286_v13, 0.0  ;;  %v313_v26 = vsel %vm200_vm1, %v287_v0, 0.0  ;;  %v825_v12 = vld [vmem:[%s942_s4] ss:$0 sm:$0xff] }
 0x177   :  { %v248_v19 = vpop.xlane.xlu1 %247  ;;  %320 = vadd.xlane.f32.xlu1 %v319_v15  ;;  %311 = vadd.xlane.f32.xlu0 %v310_v18  ;;  %v245_v20 = vpop.xlane.xlu0 %244 }
 0x178   :  { %v265_v21 = vmul.f32 0.010416667, %v248_v19  ;;  %v264_v22 = vmul.f32 0.010416667, %v245_v20  ;;  %v294_v25 = vmul.f32 %v793_v14, %v793_v14  ;;  %v295_v28 = vmul.f32 %v790_v63, %v790_v63 }
 0x17a   :  { %v801_v3 = vsub.f32 %v711_v7, %v265_v21  ;;  %v804_v2 = vsub.f32 %v709_v6, %v264_v22  ;;  %v334_v27 = vsel %vm200_vm1, %v294_v25, 0.0  ;;  %v337_v30 = vsel %vm200_vm1, %v295_v28, 0.0 }
 0x17b   :  { %314 = vadd.xlane.f32.xlu1 %v313_v26  ;;  %335 = vadd.xlane.f32.xlu0 %v334_v27 }
 0x17c   :  { %v296_v29 = vmul.f32 %v804_v2, %v804_v2  ;;  %v297_v7 = vmul.f32 %v801_v3, %v801_v3 }
 0x17e   :  { %v340_v31 = vsel %vm200_vm1, %v296_v29, 0.0  ;;  %v343_v6 = vsel %vm200_vm1, %v297_v7, 0.0 }
 0x17f   :  { %338 = vadd.xlane.f32.xlu1 %v337_v30  ;;  %341 = vadd.xlane.f32.xlu0 %v340_v31 }
 0x183   :  { %344 = vadd.xlane.f32.xlu1 %v343_v6 }
 0x1ec   :  { %v306_v32 = vpop.xlane.xlu0 %305 }
 0x1ed   :  { %v348_v35 = vmul.f32 0.010416667, %v306_v32 }
 0x1ef   :  { %v364_v36 = vadd.f32 1e-06, %v348_v35 }
 0x1f0   :  { %v309_v37 = vpop.xlane.xlu1 %308  ;;  %v330_v38 = vpop.xlane.xlu0 %329 }
 0x1f1   :  { %530 = vrsqrt.f32 %v364_v36  ;;  %v349_v39 = vmul.f32 0.010416667, %v309_v37  ;;  %v356_v40 = vmul.f32 0.010416667, %v330_v38 }
 0x1f3   :  { %v365_v41 = vadd.f32 1e-06, %v349_v39  ;;  %v372_v44 = vadd.f32 1e-06, %v356_v40 }
 0x1f4   :  { %v333_v45 = vpop.xlane.xlu1 %332  ;;  %v300_v46 = vpop.xlane.xlu0 %299 }
 0x1f5   :  { %532 = vrsqrt.f32 %v365_v41  ;;  %v357_v47 = vmul.f32 0.010416667, %v333_v45  ;;  %v346_v48 = vmul.f32 0.010416667, %v300_v46 }
 0x1f6   :  { %534 = vrsqrt.f32 %v372_v44 }
 0x1f7   :  { %v373_v51 = vadd.f32 1e-06, %v357_v47  ;;  %v362_v52 = vadd.f32 1e-06, %v346_v48 }
 0x1f8   :  { %v303_v53 = vpop.xlane.xlu1 %302  ;;  %v324_v50 = vpop.xlane.xlu0 %323 }
 0x1f9   :  { %536 = vrsqrt.f32 %v373_v51  ;;  %v347_v57 = vmul.f32 0.010416667, %v303_v53  ;;  %v354_v58 = vmul.f32 0.010416667, %v324_v50 }
 0x1fa   :  { %538 = vrsqrt.f32 %v362_v52 }
 0x1fb   :  { %v363_v59 = vadd.f32 1e-06, %v347_v57  ;;  %v370_v60 = vadd.f32 1e-06, %v354_v58 }
 0x1fc   :  { %v327_v61 = vpop.xlane.xlu1 %326  ;;  %v318_v62 = vpop.xlane.xlu0 %317 }
 0x1fd   :  { %540 = vrsqrt.f32 %v363_v59  ;;  %v355_v1 = vmul.f32 0.010416667, %v327_v61  ;;  %v352_v4 = vmul.f32 0.010416667, %v318_v62 }
 0x1fe   :  { %v531_v5 = vpop.eup %530  ;;  %542 = vrsqrt.f32 %v370_v60 }
 0x1ff   :  { %v396_v9 = vmul.f32 %v531_v5, %v725_v17  ;;  %v371_v10 = vadd.f32 1e-06, %v355_v1  ;;  %v368_v11 = vadd.f32 1e-06, %v352_v4 }
 0x200   :  { %v321_v13 = vpop.xlane.xlu1 %320  ;;  %v312_v0 = vpop.xlane.xlu0 %311 }
 0x201   :  { %v418_v15 = vmul.f32 %v819_v8, %v396_v9  ;;  %544 = vrsqrt.f32 %v371_v10  ;;  %v353_v18 = vmul.f32 0.010416667, %v321_v13  ;;  %v350_v19 = vmul.f32 0.010416667, %v312_v0 }
 0x202   :  { %v533_v20 = vpop.eup %532  ;;  %546 = vrsqrt.f32 %v368_v11 }
 0x203   :  { %v535_v21 = vpop.eup %534  ;;  %v440_v22 = vadd.f32 %v825_v12, %v418_v15  ;;  %v397_v17 = vmul.f32 %v533_v20, %v729_v23  ;;  %v369_v25 = vadd.f32 1e-06, %v353_v18  ;;  %v366_v26 = vadd.f32 1e-06, %v350_v19 }
 0x204   :  { %v404_v27 = vmul.f32 %v535_v21, %v722_v16  ;;  %v315_v28 = vpop.xlane.xlu1 %314  ;;  %v336_v29 = vpop.xlane.xlu0 %335 }
 0x205   :  { %456 = vst.msk [vmem:[%s943_s5 + $0x10] sm:$0xff] %vm200_vm1, %v440_v22  ;;  %v419_v30 = vmul.f32 %v819_v8, %v397_v17  ;;  %548 = vrsqrt.f32 %v369_v25  ;;  %v351_v31 = vmul.f32 0.010416667, %v315_v28  ;;  %v358_v7 = vmul.f32 0.010416667, %v336_v29 }
 0x206   :  { %v537_v6 = vpop.eup %536  ;;  %v426_v32 = vmul.f32 %v819_v8, %v404_v27  ;;  %550 = vrsqrt.f32 %v366_v26 }
 0x207   :  { %v539_v23 = vpop.eup %538  ;;  %v441_v35 = vadd.f32 %v825_v12, %v419_v30  ;;  %v405_v16 = vmul.f32 %v537_v6, %v742_v33  ;;  %v367_v36 = vadd.f32 1e-06, %v351_v31  ;;  %v374_v37 = vadd.f32 1e-06, %v358_v7 }
 0x208   :  { %v448_v38 = vadd.f32 %v825_v12, %v426_v32  ;;  %v394_v39 = vmul.f32 %v539_v23, %v732_v24  ;;  %v339_v40 = vpop.xlane.xlu1 %338  ;;  %v342_v41 = vpop.xlane.xlu0 %341 }
 0x209   :  { %457 = vst.msk [vmem:[%s943_s5 + $0x18] sm:$0xff] %vm200_vm1, %v441_v35  ;;  %v427_v44 = vmul.f32 %v819_v8, %v405_v16  ;;  %552 = vrsqrt.f32 %v367_v36  ;;  %v359_v45 = vmul.f32 0.010416667, %v339_v40  ;;  %v360_v46 = vmul.f32 0.010416667, %v342_v41 }
 0x20a   :  { %v541_v47 = vpop.eup %540  ;;  %464 = vst.msk [vmem:[%s943_s5 + $0x50] sm:$0xff] %vm200_vm1, %v448_v38  ;;  %v416_v24 = vmul.f32 %v819_v8, %v394_v39  ;;  %554 = vrsqrt.f32 %v374_v37 }
 0x20b   :  { %v543_v33 = vpop.eup %542  ;;  %v449_v48 = vadd.f32 %v825_v12, %v427_v44  ;;  %v395_v51 = vmul.f32 %v541_v47, %v756_v42  ;;  %v375_v52 = vadd.f32 1e-06, %v359_v45  ;;  %v376_v53 = vadd.f32 1e-06, %v360_v46 }
 0x20c   :  { %v438_v50 = vadd.f32 %v825_v12, %v416_v24  ;;  %v402_v57 = vmul.f32 %v543_v33, %v745_v34  ;;  %v345_v58 = vpop.xlane.xlu1 %344 }
 0x20d   :  { %465 = vst.msk [vmem:[%s943_s5 + $0x58] sm:$0xff] %vm200_vm1, %v449_v48  ;;  %v417_v59 = vmul.f32 %v819_v8, %v395_v51  ;;  %556 = vrsqrt.f32 %v375_v52  ;;  %v361_v60 = vmul.f32 0.010416667, %v345_v58 }
 0x20e   :  { %v545_v61 = vpop.eup %544  ;;  %454 = vst.msk [vmem:[%s943_s5] sm:$0xff] %vm200_vm1, %v438_v50  ;;  %v424_v42 = vmul.f32 %v819_v8, %v402_v57  ;;  %558 = vrsqrt.f32 %v376_v53 }
 0x20f   :  { %v547_v34 = vpop.eup %546  ;;  %v439_v62 = vadd.f32 %v825_v12, %v417_v59  ;;  %v403_v1 = vmul.f32 %v545_v61, %v753_v43  ;;  %v377_v4 = vadd.f32 1e-06, %v361_v60 }
 0x210   :  { %v446_v5 = vadd.f32 %v825_v12, %v424_v42  ;;  %v400_v9 = vmul.f32 %v547_v34, %v769_v54 }
 0x211   :  { %455 = vst.msk [vmem:[%s943_s5 + $0x8] sm:$0xff] %vm200_vm1, %v439_v62  ;;  %v425_v10 = vmul.f32 %v819_v8, %v403_v1  ;;  %560 = vrsqrt.f32 %v377_v4 }
 0x212   :  { %v549_v11 = vpop.eup %548  ;;  %462 = vst.msk [vmem:[%s943_s5 + $0x40] sm:$0xff] %vm200_vm1, %v446_v5  ;;  %v422_v43 = vmul.f32 %v819_v8, %v400_v9 }
 0x213   :  { %v551_v13 = vpop.eup %550  ;;  %v447_v0 = vadd.f32 %v825_v12, %v425_v10  ;;  %v401_v54 = vmul.f32 %v549_v11, %v766_v49 }
 0x214   :  { %v444_v15 = vadd.f32 %v825_v12, %v422_v43  ;;  %v398_v18 = vmul.f32 %v551_v13, %v780_v55 }
 0x215   :  { %463 = vst.msk [vmem:[%s943_s5 + $0x48] sm:$0xff] %vm200_vm1, %v447_v0  ;;  %v423_v19 = vmul.f32 %v819_v8, %v401_v54 }
 0x216   :  { %v553_v20 = vpop.eup %552  ;;  %460 = vst.msk [vmem:[%s943_s5 + $0x30] sm:$0xff] %vm200_vm1, %v444_v15  ;;  %v420_v21 = vmul.f32 %v819_v8, %v398_v18 }
 0x217   :  { %v555_v49 = vpop.eup %554  ;;  %v445_v22 = vadd.f32 %v825_v12, %v423_v19  ;;  %v399_v55 = vmul.f32 %v553_v20, %v777_v56 }
 0x218   :  { %v442_v17 = vadd.f32 %v825_v12, %v420_v21  ;;  %v406_v25 = vmul.f32 %v555_v49, %v793_v14 }
 0x219   :  { %461 = vst.msk [vmem:[%s943_s5 + $0x38] sm:$0xff] %vm200_vm1, %v445_v22  ;;  %v421_v26 = vmul.f32 %v819_v8, %v399_v55 }
 0x21a   :  { %v557_v27 = vpop.eup %556  ;;  %458 = vst.msk [vmem:[%s943_s5 + $0x20] sm:$0xff] %vm200_vm1, %v442_v17  ;;  %v428_v28 = vmul.f32 %v819_v8, %v406_v25 }
 0x21b   :  { %v559_v56 = vpop.eup %558  ;;  %v443_v29 = vadd.f32 %v825_v12, %v421_v26  ;;  %v407_v14 = vmul.f32 %v557_v27, %v790_v63 }
 0x21c   :  { %v450_v30 = vadd.f32 %v825_v12, %v428_v28  ;;  %v408_v31 = vmul.f32 %v559_v56, %v804_v2 }
 0x21d   :  { %459 = vst.msk [vmem:[%s943_s5 + $0x28] sm:$0xff] %vm200_vm1, %v443_v29  ;;  %v429_v7 = vmul.f32 %v819_v8, %v407_v14 }
 0x21e   :  { %v561_v6 = vpop.eup %560  ;;  %466 = vst.msk [vmem:[%s943_s5 + $0x60] sm:$0xff] %vm200_vm1, %v450_v30  ;;  %v430_v32 = vmul.f32 %v819_v8, %v408_v31 }
 0x21f   :  { %v451_v63 = vadd.f32 %v825_v12, %v429_v7  ;;  %v409_v23 = vmul.f32 %v561_v6, %v801_v3 }
 0x220   :  { %v452_v2 = vadd.f32 %v825_v12, %v430_v32 }
 0x221   :  { %467 = vst.msk [vmem:[%s943_s5 + $0x68] sm:$0xff] %vm200_vm1, %v451_v63  ;;  %v431_v35 = vmul.f32 %v819_v8, %v409_v23 }
 0x222   :  { %468 = vst.msk [vmem:[%s943_s5 + $0x70] sm:$0xff] %vm200_vm1, %v452_v2 }
 0x223   :  { %v453_v16 = vadd.f32 %v825_v12, %v431_v35 }
 0x225   :  { %469 = vst.msk [vmem:[%s943_s5 + $0x78] sm:$0xff] %vm200_vm1, %v453_v16 }

</bundles_post_ra>
